<compile_context>
chip_gen: v6e
topology: v6e:2x2x1
jax: 0.10.0
libtpu: 0.0.40
codegen_flags: <defaults>
</compile_context>

<pallas_src>
import math

import jax
import jax.numpy as jnp
from jax import lax
from jax.experimental import pallas as pl
from jax.experimental.pallas import tpu as pltpu


def _round_up(v, m):
    return (v + m - 1) // m * m


# ---------------------------------------------------------------------------
# Kernel body factory (static network structure baked in via closure)
# ---------------------------------------------------------------------------

def _make_fused_kernel(block_meta, n_valid, nlp):
    inv_n = 1.0 / float(n_valid)          # 1 / (N * L) for BN batch statistics

    def kernel(*refs):
        refs = list(refs)
        o_ref = refs.pop()                 # output: (N, P_pad)
        it = iter(refs)
        x = next(it)[...]                  # (C0_pad, N*L_pad) activations f32
        valid = next(it)[...]              # (1, N*L_pad): 1.0 at real positions
        pool_t = next(it)[...]             # (N, N*L_pad): per-sample mean weights

        def conv(v, w_ref, ksz):
            """'Same'-padded conv1d as ONE (C_out, K*C_in)x(K*C_in, N*L) matmul.

            Shifted views come from pltpu.roll on the lane axis; the per-sample
            zero tail (width >= max overhang) makes the wrapped-in values zero,
            so a single mask multiply per conv replaces all padding copies.
            """
            w = w_ref[...]
            if ksz == 1:
                cols = v
            else:
                vm = v * valid                               # re-zero the tails
                pad_l = (ksz - 1) // 2                       # extra pad on the right
                taps = []
                for k in range(ksz):
                    s = (pad_l - k) % nlp
                    taps.append(vm if s == 0 else pltpu.roll(vm, s, axis=1))
                cols = jnp.concatenate(taps, axis=0)         # (K*C_in_pad, N*L_pad)
            return jnp.dot(w, cols.astype(w.dtype),
                           preferred_element_type=jnp.float32)

        def bn_relu(res, gamma, beta):
            """relu(batchnorm1d(res)); training-mode batch stats, eps=1e-5."""
            rm = res * valid
            mean = jnp.sum(rm, axis=1, keepdims=True) * inv_n        # (C, 1)
            cen = rm - mean
            cen_v = cen * valid                                      # exclude tails
            var = jnp.sum(cen_v * cen_v, axis=1, keepdims=True) * inv_n
            y = cen * lax.rsqrt(var + 1e-5) * gamma + beta
            return jnp.maximum(y, 0.0)

        for meta in block_meta:
            org = x
            if meta["has_bottleneck"]:
                x = conv(x, next(it), 1)
            for ksz in meta["kernel_sizes"]:
                x = conv(x, next(it), ksz)
            if meta["use_residual"]:
                rw = next(it)
                gamma = next(it)[...]
                beta = next(it)[...]
                x = x + bn_relu(conv(org, rw, 1), gamma, beta)
            # NOTE: reference InceptionBlock.forward never applies its own
            # self.batchnorm / self.relu to the main path -> intentionally omitted.

        # Fused head: Linear applied per position, then masked mean over L.
        # (Linear and mean commute; pool_t carries the 1/L and the valid mask.)
        lin_w = next(it)[...]              # (P_pad, C_last_pad)
        lin_b = next(it)[...]              # (1, P_pad)
        z = jnp.dot(lin_w, x.astype(lin_w.dtype),
                    preferred_element_type=jnp.float32)      # (P_pad, N*L_pad)
        out = lax.dot_general(pool_t, z, (((1,), (1,)), ((), ())),
                              preferred_element_type=jnp.float32) + lin_b
        o_ref[...] = out.astype(o_ref.dtype)                 # lane-dense (N, P_pad)

    return kernel


# ---------------------------------------------------------------------------
# JAX wrapper: layout plumbing + single pallas_call
# ---------------------------------------------------------------------------

def inception_forward(params, x, *, use_bf16=False):
    """x: (N, C_in, L) float32 -> logits (N, num_pred_classes).

    use_bf16=False keeps matmul operands in f32 for bit-faithful semantics;
    set True to run conv/head matmul operands in bf16 (f32 accumulate) for
    2x MXU rate on v6e/v7x.
    """
    N, C_in, L = (int(s) for s in x.shape)
    x = x.astype(jnp.float32)
    wdtype = jnp.bfloat16 if use_bf16 else jnp.float32

    def cpad(c):
        return _round_up(c, 8)

    # --- per-sample length padding (lane-friendly, covers the max conv overhang)
    ksizes = [1]
    for blk in params["blocks"]:
        ksizes += [int(w.shape[2]) for w in blk["convs"]]
    overhang = max((k - 1) - (k - 1) // 2 for k in ksizes)
    lane_mult = 128 // math.gcd(N, 128)
    L_pad = _round_up(L + overhang, lane_mult)
    NLp = N * L_pad

    def prep_conv(w):                       # (C_out, C_in, K) -> (C_out_pad, K*C_in_pad)
        c_out, c_in, k = (int(s) for s in w.shape)
        w = jnp.transpose(w, (0, 2, 1))                          # (C_out, K, C_in)
        w = jnp.pad(w, ((0, cpad(c_out) - c_out), (0, 0), (0, cpad(c_in) - c_in)))
        return w.reshape(cpad(c_out), k * cpad(c_in)).astype(wdtype)

    # --- input activations -> (C0_pad, N*L_pad), flattened (sample, pos) on lanes
    C0p = cpad(C_in)
    x2d = jnp.pad(x, ((0, 0), (0, C0p - C_in), (0, L_pad - L)))
    x2d = jnp.transpose(x2d, (1, 0, 2)).reshape(C0p, NLp)

    pos = jnp.arange(NLp, dtype=jnp.int32)
    l_idx = pos % L_pad
    n_idx = pos // L_pad
    valid = (l_idx < L).astype(jnp.float32).reshape(1, NLp)
    pool_t = jnp.where(
        (n_idx[None, :] == jnp.arange(N, dtype=jnp.int32)[:, None]) & (l_idx[None, :] < L),
        jnp.float32(1.0 / L), jnp.float32(0.0))                  # (N, NLp)

    block_meta = []
    inputs = [x2d, valid, pool_t]
    flops = 0
    trans = 0
    max_act = C0p
    max_cols = C0p
    for blk in params["blocks"]:
        meta = {"has_bottleneck": "bottleneck" in blk,
                "kernel_sizes": [int(w.shape[2]) for w in blk["convs"]],
                "use_residual": bool(blk["use_residual"])}
        block_meta.append(meta)
        convs = ([blk["bottleneck"]] if meta["has_bottleneck"] else []) + list(blk["convs"])
        if meta["use_residual"]:
            convs = convs + [blk["res_conv"]]
        for w in convs:
            w2 = prep_conv(w)
            if w is blk["convs"][-1] or True:
                max_act = max(max_act, int(w2.shape[0]))
                max_cols = max(max_cols, int(w2.shape[1]))
        if meta["has_bottleneck"]:
            inputs.append(prep_conv(blk["bottleneck"]))
        for w in blk["convs"]:
            inputs.append(prep_conv(w))
        if meta["use_residual"]:
            c_out = int(blk["res_gamma"].shape[0])
            cp = cpad(c_out)
            inputs.append(prep_conv(blk["res_conv"]))
            inputs.append(jnp.pad(blk["res_gamma"], (0, cp - c_out)).reshape(cp, 1)
                          .astype(jnp.float32))
            inputs.append(jnp.pad(blk["res_beta"], (0, cp - c_out)).reshape(cp, 1)
                          .astype(jnp.float32))
            trans += cp
        for w in convs:
            c_out, c_in, k = (int(s) for s in w.shape)
            flops += 2 * cpad(c_out) * k * cpad(c_in) * NLp

    # --- head weights: (P, C_last) -> (P_pad=mult of 128, C_last_pad); bias (1, P_pad)
    lin_w = params["linear_w"]
    lin_b = params["linear_b"]
    P, C_last = (int(s) for s in lin_w.shape)
    Pp = _round_up(P, 128)
    Clp = cpad(C_last)
    inputs.append(jnp.pad(lin_w, ((0, Pp - P), (0, Clp - C_last))).astype(wdtype))
    inputs.append(jnp.pad(lin_b, (0, Pp - P)).reshape(1, Pp).astype(jnp.float32))
    flops += 2 * Pp * Clp * NLp + 2 * N * NLp * Pp

    out_bytes = N * Pp * 4
    in_bytes = sum(int(a.size) * jnp.dtype(a.dtype).itemsize for a in inputs)
    bytes_acc = int(in_bytes + out_bytes)
    est = (in_bytes + out_bytes
           + 4 * max_act * NLp * 4          # a few live activations (x, org, res, bn)
           + 2 * max_cols * NLp * 4         # im2col cols buffer
           + (1 << 20))
    vmem_limit = int(min(64 << 20, max(32 << 20, est)))

    kernel = _make_fused_kernel(block_meta, n_valid=N * L, nlp=NLp)
    vmem_spec = pl.BlockSpec(memory_space=pltpu.MemorySpace.VMEM)

    out = pl.pallas_call(
        kernel,
        out_shape=jax.ShapeDtypeStruct((N, Pp), jnp.float32),
        in_specs=[vmem_spec] * len(inputs),
        out_specs=vmem_spec,
        compiler_params=pltpu.CompilerParams(vmem_limit_bytes=vmem_limit),
        cost_estimate=pl.CostEstimate(flops=int(flops), transcendentals=int(trans),
                                      bytes_accessed=bytes_acc),
    )(*inputs)
    return out[:, :P]


# ---------------------------------------------------------------------------
# Deterministic parameter init (PyTorch weight layouts)
# ---------------------------------------------------------------------------

def init_inception_params(key, num_blocks, in_channels, out_channels,
                          bottleneck_channels, kernel_sizes,
                          use_residuals="default", num_pred_classes=1):
    def expand(v):
        if isinstance(v, list):
            assert len(v) == num_blocks
            return v
        return [v] * num_blocks

    out_channels = expand(out_channels)
    bottleneck_channels = expand(bottleneck_channels)
    kernel_sizes = expand(kernel_sizes)
    if use_residuals == "default":
        use_residuals = [i % 3 == 2 for i in range(num_blocks)]
    use_residuals = expand(use_residuals)
    channels = [in_channels] + out_channels

    def init_w(k, shape, fan_in):
        return (jax.random.normal(k, shape, jnp.float32) /
                jnp.sqrt(jnp.float32(fan_in)))

    blocks = []
    for i in range(num_blocks):
        c_in, c_out = channels[i], channels[i + 1]
        bott = bottleneck_channels[i]
        ksz = kernel_sizes[i]
        assert ksz > 3
        kernel_size_s = [ksz // (2 ** j) for j in range(3)]
        key, *ks = jax.random.split(key, 8)
        blk = {"use_residual": use_residuals[i]}
        if bott > 0:
            blk["bottleneck"] = init_w(ks[0], (bott, c_in, 1), c_in)
            start = bott
        else:
            start = c_in
        chain = [start] + [c_out] * 3
        blk["convs"] = [init_w(ks[1 + j],
                               (chain[j + 1], chain[j], kernel_size_s[j]),
                               chain[j] * kernel_size_s[j])
                        for j in range(3)]
        if use_residuals[i]:
            blk["res_conv"] = init_w(ks[5], (c_out, c_in, 1), c_in)
            blk["res_gamma"] = jnp.ones((c_out,), jnp.float32)
            blk["res_beta"] = jnp.zeros((c_out,), jnp.float32)
        blocks.append(blk)

    key, k_w, k_b = jax.random.split(key, 3)
    linear_w = init_w(k_w, (num_pred_classes, channels[-1]), channels[-1])
    linear_b = init_w(k_b, (num_pred_classes,), channels[-1])
    return {"blocks": blocks, "linear_w": linear_w, "linear_b": linear_b}


# ---------------------------------------------------------------------------
# Pure-JAX reference (mirrors the PyTorch module) for correctness validation
# ---------------------------------------------------------------------------

def _reference_forward(params, x):
    def conv(v, w):
        k = int(w.shape[2])
        pad = k - 1
        if pad % 2 != 0:
            v = jnp.pad(v, ((0, 0), (0, 0), (0, 1)))
        return lax.conv_general_dilated(v, w, window_strides=(1,),
                                        padding=[(pad // 2, pad // 2)],
                                        dimension_numbers=("NCH", "OIH", "NCH"))

    def bn_relu(v, g, b):
        mean = jnp.mean(v, axis=(0, 2), keepdims=True)
        var = jnp.mean((v - mean) ** 2, axis=(0, 2), keepdims=True)
        y = (v - mean) * lax.rsqrt(var + 1e-5) * g.reshape(1, -1, 1) + b.reshape(1, -1, 1)
        return jnp.maximum(y, 0.0)

    v = x.astype(jnp.float32)
    for blk in params["blocks"]:
        org = v
        if "bottleneck" in blk:
            v = conv(v, blk["bottleneck"])
        for w in blk["convs"]:
            v = conv(v, w)
        if blk["use_residual"]:
            v = v + bn_relu(conv(org, blk["res_conv"]), blk["res_gamma"], blk["res_beta"])
    feat = jnp.mean(v, axis=2)
    return feat @ params["linear_w"].T + params["linear_b"]


if __name__ == "__main__":
    key = jax.random.PRNGKey(0)
    k_param, k_x = jax.random.split(key)

    # Small config: 3 blocks, in=4, hidden=8, bottleneck=4, kernel=9 -> [9,4,2],
    # residuals 'default' -> [False, False, True], 3 prediction classes.
    params = init_inception_params(
        k_param,
        num_blocks=3,
        in_channels=4,
        out_channels=8,
        bottleneck_channels=4,
        kernel_sizes=9,
        use_residuals="default",
        num_pred_classes=3,
    )

    x = jax.random.normal(k_x, (2, 4, 16), jnp.float32)     # (N, C_in, L)
    out = inception_forward(params, x)
    out = jax.block_until_ready(out)

    assert out.shape == (2, 3)
    assert bool(jnp.all(jnp.isfinite(out)))
    ref = _reference_forward(params, x)
    assert bool(jnp.allclose(out, ref, rtol=1e-3, atol=1e-3)), (
        float(jnp.max(jnp.abs(out - ref))))
    print("KERNEL_OK")
</pallas_src>

<mosaic_0001>
module attributes {stable_mosaic.version = 11 : i64} {
  func.func @kernel(%arg0: memref<8x128xf32, #tpu.memory_space<vmem>>, %arg1: memref<1x128xf32, #tpu.memory_space<vmem>>, %arg2: memref<2x128xf32, #tpu.memory_space<vmem>>, %arg3: memref<8x8xf32, #tpu.memory_space<vmem>>, %arg4: memref<8x72xf32, #tpu.memory_space<vmem>>, %arg5: memref<8x32xf32, #tpu.memory_space<vmem>>, %arg6: memref<8x16xf32, #tpu.memory_space<vmem>>, %arg7: memref<8x8xf32, #tpu.memory_space<vmem>>, %arg8: memref<8x72xf32, #tpu.memory_space<vmem>>, %arg9: memref<8x32xf32, #tpu.memory_space<vmem>>, %arg10: memref<8x16xf32, #tpu.memory_space<vmem>>, %arg11: memref<8x8xf32, #tpu.memory_space<vmem>>, %arg12: memref<8x72xf32, #tpu.memory_space<vmem>>, %arg13: memref<8x32xf32, #tpu.memory_space<vmem>>, %arg14: memref<8x16xf32, #tpu.memory_space<vmem>>, %arg15: memref<8x8xf32, #tpu.memory_space<vmem>>, %arg16: memref<8x1xf32, #tpu.memory_space<vmem>>, %arg17: memref<8x1xf32, #tpu.memory_space<vmem>>, %arg18: memref<128x8xf32, #tpu.memory_space<vmem>>, %arg19: memref<1x128xf32, #tpu.memory_space<vmem>>, %arg20: memref<2x128xf32, #tpu.memory_space<vmem>>) attributes {dimension_semantics = [], scalar_prefetch = 0 : i64, scratch_operands = 0 : i64, tpu.core_type = #tpu.core_type<tc>} {
    %c0 = arith.constant 0 : index
    %c0_0 = arith.constant 0 : index
    %0 = vector.load %arg0[%c0, %c0_0] : memref<8x128xf32, #tpu.memory_space<vmem>>, vector<8x128xf32>
    %c0_1 = arith.constant 0 : index
    %c0_2 = arith.constant 0 : index
    %1 = vector.load %arg1[%c0_1, %c0_2] : memref<1x128xf32, #tpu.memory_space<vmem>>, vector<1x128xf32>
    %c0_3 = arith.constant 0 : index
    %c0_4 = arith.constant 0 : index
    %2 = vector.load %arg2[%c0_3, %c0_4] : memref<2x128xf32, #tpu.memory_space<vmem>>, vector<2x128xf32>
    %c0_5 = arith.constant 0 : index
    %c0_6 = arith.constant 0 : index
    %3 = vector.load %arg3[%c0_5, %c0_6] : memref<8x8xf32, #tpu.memory_space<vmem>>, vector<8x8xf32>
    %cst = arith.constant dense<0.000000e+00> : vector<8x128xf32>
    %4 = tpu.matmul %3, %0, %cst {dimension_numbers = #tpu.dot_dimension_numbers<[1], [0], [0], [1], [0, 0, 1, 1], [], []>} : vector<8x8xf32>, vector<8x128xf32>, vector<8x128xf32> -> vector<8x128xf32>
    %c0_7 = arith.constant 0 : index
    %c0_8 = arith.constant 0 : index
    %5 = vector.load %arg4[%c0_7, %c0_8] : memref<8x72xf32, #tpu.memory_space<vmem>>, vector<8x72xf32>
    %6 = vector.broadcast %1 : vector<1x128xf32> to vector<8x128xf32>
    %7 = arith.mulf %4, %6 : vector<8x128xf32>
    %c4_i32 = arith.constant 4 : i32
    %8 = tpu.dynamic_rotate %7 by %c4_i32 dim 1 : vector<8x128xf32>, i32 -> vector<8x128xf32>
    %c3_i32 = arith.constant 3 : i32
    %9 = tpu.dynamic_rotate %7 by %c3_i32 dim 1 : vector<8x128xf32>, i32 -> vector<8x128xf32>
    %c2_i32 = arith.constant 2 : i32
    %10 = tpu.dynamic_rotate %7 by %c2_i32 dim 1 : vector<8x128xf32>, i32 -> vector<8x128xf32>
    %c1_i32 = arith.constant 1 : i32
    %11 = tpu.dynamic_rotate %7 by %c1_i32 dim 1 : vector<8x128xf32>, i32 -> vector<8x128xf32>
    %c127_i32 = arith.constant 127 : i32
    %12 = tpu.dynamic_rotate %7 by %c127_i32 dim 1 : vector<8x128xf32>, i32 -> vector<8x128xf32>
    %c126_i32 = arith.constant 126 : i32
    %13 = tpu.dynamic_rotate %7 by %c126_i32 dim 1 : vector<8x128xf32>, i32 -> vector<8x128xf32>
    %c125_i32 = arith.constant 125 : i32
    %14 = tpu.dynamic_rotate %7 by %c125_i32 dim 1 : vector<8x128xf32>, i32 -> vector<8x128xf32>
    %c124_i32 = arith.constant 124 : i32
    %15 = tpu.dynamic_rotate %7 by %c124_i32 dim 1 : vector<8x128xf32>, i32 -> vector<8x128xf32>
    %16 = tpu.concatenate %8, %9, %10, %11, %7, %12, %13, %14, %15 in 0 : vector<8x128xf32>, vector<8x128xf32>, vector<8x128xf32>, vector<8x128xf32>, vector<8x128xf32>, vector<8x128xf32>, vector<8x128xf32>, vector<8x128xf32>, vector<8x128xf32> -> vector<72x128xf32>
    %cst_9 = arith.constant dense<0.000000e+00> : vector<8x128xf32>
    %17 = tpu.matmul %5, %16, %cst_9 {dimension_numbers = #tpu.dot_dimension_numbers<[1], [0], [0], [1], [0, 0, 1, 1], [], []>} : vector<8x72xf32>, vector<72x128xf32>, vector<8x128xf32> -> vector<8x128xf32>
    %c0_10 = arith.constant 0 : index
    %c0_11 = arith.constant 0 : index
    %18 = vector.load %arg5[%c0_10, %c0_11] : memref<8x32xf32, #tpu.memory_space<vmem>>, vector<8x32xf32>
    %19 = vector.broadcast %1 : vector<1x128xf32> to vector<8x128xf32>
    %20 = arith.mulf %17, %19 : vector<8x128xf32>
    %c1_i32_12 = arith.constant 1 : i32
    %21 = tpu.dynamic_rotate %20 by %c1_i32_12 dim 1 : vector<8x128xf32>, i32 -> vector<8x128xf32>
    %c127_i32_13 = arith.constant 127 : i32
    %22 = tpu.dynamic_rotate %20 by %c127_i32_13 dim 1 : vector<8x128xf32>, i32 -> vector<8x128xf32>
    %c126_i32_14 = arith.constant 126 : i32
    %23 = tpu.dynamic_rotate %20 by %c126_i32_14 dim 1 : vector<8x128xf32>, i32 -> vector<8x128xf32>
    %24 = tpu.concatenate %21, %20, %22, %23 in 0 : vector<8x128xf32>, vector<8x128xf32>, vector<8x128xf32>, vector<8x128xf32> -> vector<32x128xf32>
    %cst_15 = arith.constant dense<0.000000e+00> : vector<8x128xf32>
    %25 = tpu.matmul %18, %24, %cst_15 {dimension_numbers = #tpu.dot_dimension_numbers<[1], [0], [0], [1], [0, 0, 1, 1], [], []>} : vector<8x32xf32>, vector<32x128xf32>, vector<8x128xf32> -> vector<8x128xf32>
    %c0_16 = arith.constant 0 : index
    %c0_17 = arith.constant 0 : index
    %26 = vector.load %arg6[%c0_16, %c0_17] : memref<8x16xf32, #tpu.memory_space<vmem>>, vector<8x16xf32>
    %27 = vector.broadcast %1 : vector<1x128xf32> to vector<8x128xf32>
    %28 = arith.mulf %25, %27 : vector<8x128xf32>
    %c127_i32_18 = arith.constant 127 : i32
    %29 = tpu.dynamic_rotate %28 by %c127_i32_18 dim 1 : vector<8x128xf32>, i32 -> vector<8x128xf32>
    %30 = tpu.concatenate %28, %29 in 0 : vector<8x128xf32>, vector<8x128xf32> -> vector<16x128xf32>
    %cst_19 = arith.constant dense<0.000000e+00> : vector<8x128xf32>
    %31 = tpu.matmul %26, %30, %cst_19 {dimension_numbers = #tpu.dot_dimension_numbers<[1], [0], [0], [1], [0, 0, 1, 1], [], []>} : vector<8x16xf32>, vector<16x128xf32>, vector<8x128xf32> -> vector<8x128xf32>
    %c0_20 = arith.constant 0 : index
    %c0_21 = arith.constant 0 : index
    %32 = vector.load %arg7[%c0_20, %c0_21] : memref<8x8xf32, #tpu.memory_space<vmem>>, vector<8x8xf32>
    %cst_22 = arith.constant dense<0.000000e+00> : vector<8x128xf32>
    %33 = tpu.matmul %32, %31, %cst_22 {dimension_numbers = #tpu.dot_dimension_numbers<[1], [0], [0], [1], [0, 0, 1, 1], [], []>} : vector<8x8xf32>, vector<8x128xf32>, vector<8x128xf32> -> vector<8x128xf32>
    %c0_23 = arith.constant 0 : index
    %c0_24 = arith.constant 0 : index
    %34 = vector.load %arg8[%c0_23, %c0_24] : memref<8x72xf32, #tpu.memory_space<vmem>>, vector<8x72xf32>
    %35 = vector.broadcast %1 : vector<1x128xf32> to vector<8x128xf32>
    %36 = arith.mulf %33, %35 : vector<8x128xf32>
    %c4_i32_25 = arith.constant 4 : i32
    %37 = tpu.dynamic_rotate %36 by %c4_i32_25 dim 1 : vector<8x128xf32>, i32 -> vector<8x128xf32>
    %c3_i32_26 = arith.constant 3 : i32
    %38 = tpu.dynamic_rotate %36 by %c3_i32_26 dim 1 : vector<8x128xf32>, i32 -> vector<8x128xf32>
    %c2_i32_27 = arith.constant 2 : i32
    %39 = tpu.dynamic_rotate %36 by %c2_i32_27 dim 1 : vector<8x128xf32>, i32 -> vector<8x128xf32>
    %c1_i32_28 = arith.constant 1 : i32
    %40 = tpu.dynamic_rotate %36 by %c1_i32_28 dim 1 : vector<8x128xf32>, i32 -> vector<8x128xf32>
    %c127_i32_29 = arith.constant 127 : i32
    %41 = tpu.dynamic_rotate %36 by %c127_i32_29 dim 1 : vector<8x128xf32>, i32 -> vector<8x128xf32>
    %c126_i32_30 = arith.constant 126 : i32
    %42 = tpu.dynamic_rotate %36 by %c126_i32_30 dim 1 : vector<8x128xf32>, i32 -> vector<8x128xf32>
    %c125_i32_31 = arith.constant 125 : i32
    %43 = tpu.dynamic_rotate %36 by %c125_i32_31 dim 1 : vector<8x128xf32>, i32 -> vector<8x128xf32>
    %c124_i32_32 = arith.constant 124 : i32
    %44 = tpu.dynamic_rotate %36 by %c124_i32_32 dim 1 : vector<8x128xf32>, i32 -> vector<8x128xf32>
    %45 = tpu.concatenate %37, %38, %39, %40, %36, %41, %42, %43, %44 in 0 : vector<8x128xf32>, vector<8x128xf32>, vector<8x128xf32>, vector<8x128xf32>, vector<8x128xf32>, vector<8x128xf32>, vector<8x128xf32>, vector<8x128xf32>, vector<8x128xf32> -> vector<72x128xf32>
    %cst_33 = arith.constant dense<0.000000e+00> : vector<8x128xf32>
    %46 = tpu.matmul %34, %45, %cst_33 {dimension_numbers = #tpu.dot_dimension_numbers<[1], [0], [0], [1], [0, 0, 1, 1], [], []>} : vector<8x72xf32>, vector<72x128xf32>, vector<8x128xf32> -> vector<8x128xf32>
    %c0_34 = arith.constant 0 : index
    %c0_35 = arith.constant 0 : index
    %47 = vector.load %arg9[%c0_34, %c0_35] : memref<8x32xf32, #tpu.memory_space<vmem>>, vector<8x32xf32>
    %48 = vector.broadcast %1 : vector<1x128xf32> to vector<8x128xf32>
    %49 = arith.mulf %46, %48 : vector<8x128xf32>
    %c1_i32_36 = arith.constant 1 : i32
    %50 = tpu.dynamic_rotate %49 by %c1_i32_36 dim 1 : vector<8x128xf32>, i32 -> vector<8x128xf32>
    %c127_i32_37 = arith.constant 127 : i32
    %51 = tpu.dynamic_rotate %49 by %c127_i32_37 dim 1 : vector<8x128xf32>, i32 -> vector<8x128xf32>
    %c126_i32_38 = arith.constant 126 : i32
    %52 = tpu.dynamic_rotate %49 by %c126_i32_38 dim 1 : vector<8x128xf32>, i32 -> vector<8x128xf32>
    %53 = tpu.concatenate %50, %49, %51, %52 in 0 : vector<8x128xf32>, vector<8x128xf32>, vector<8x128xf32>, vector<8x128xf32> -> vector<32x128xf32>
    %cst_39 = arith.constant dense<0.000000e+00> : vector<8x128xf32>
    %54 = tpu.matmul %47, %53, %cst_39 {dimension_numbers = #tpu.dot_dimension_numbers<[1], [0], [0], [1], [0, 0, 1, 1], [], []>} : vector<8x32xf32>, vector<32x128xf32>, vector<8x128xf32> -> vector<8x128xf32>
    %c0_40 = arith.constant 0 : index
    %c0_41 = arith.constant 0 : index
    %55 = vector.load %arg10[%c0_40, %c0_41] : memref<8x16xf32, #tpu.memory_space<vmem>>, vector<8x16xf32>
    %56 = vector.broadcast %1 : vector<1x128xf32> to vector<8x128xf32>
    %57 = arith.mulf %54, %56 : vector<8x128xf32>
    %c127_i32_42 = arith.constant 127 : i32
    %58 = tpu.dynamic_rotate %57 by %c127_i32_42 dim 1 : vector<8x128xf32>, i32 -> vector<8x128xf32>
    %59 = tpu.concatenate %57, %58 in 0 : vector<8x128xf32>, vector<8x128xf32> -> vector<16x128xf32>
    %cst_43 = arith.constant dense<0.000000e+00> : vector<8x128xf32>
    %60 = tpu.matmul %55, %59, %cst_43 {dimension_numbers = #tpu.dot_dimension_numbers<[1], [0], [0], [1], [0, 0, 1, 1], [], []>} : vector<8x16xf32>, vector<16x128xf32>, vector<8x128xf32> -> vector<8x128xf32>
    %c0_44 = arith.constant 0 : index
    %c0_45 = arith.constant 0 : index
    %61 = vector.load %arg11[%c0_44, %c0_45] : memref<8x8xf32, #tpu.memory_space<vmem>>, vector<8x8xf32>
    %cst_46 = arith.constant dense<0.000000e+00> : vector<8x128xf32>
    %62 = tpu.matmul %61, %60, %cst_46 {dimension_numbers = #tpu.dot_dimension_numbers<[1], [0], [0], [1], [0, 0, 1, 1], [], []>} : vector<8x8xf32>, vector<8x128xf32>, vector<8x128xf32> -> vector<8x128xf32>
    %c0_47 = arith.constant 0 : index
    %c0_48 = arith.constant 0 : index
    %63 = vector.load %arg12[%c0_47, %c0_48] : memref<8x72xf32, #tpu.memory_space<vmem>>, vector<8x72xf32>
    %64 = vector.broadcast %1 : vector<1x128xf32> to vector<8x128xf32>
    %65 = arith.mulf %62, %64 : vector<8x128xf32>
    %c4_i32_49 = arith.constant 4 : i32
    %66 = tpu.dynamic_rotate %65 by %c4_i32_49 dim 1 : vector<8x128xf32>, i32 -> vector<8x128xf32>
    %c3_i32_50 = arith.constant 3 : i32
    %67 = tpu.dynamic_rotate %65 by %c3_i32_50 dim 1 : vector<8x128xf32>, i32 -> vector<8x128xf32>
    %c2_i32_51 = arith.constant 2 : i32
    %68 = tpu.dynamic_rotate %65 by %c2_i32_51 dim 1 : vector<8x128xf32>, i32 -> vector<8x128xf32>
    %c1_i32_52 = arith.constant 1 : i32
    %69 = tpu.dynamic_rotate %65 by %c1_i32_52 dim 1 : vector<8x128xf32>, i32 -> vector<8x128xf32>
    %c127_i32_53 = arith.constant 127 : i32
    %70 = tpu.dynamic_rotate %65 by %c127_i32_53 dim 1 : vector<8x128xf32>, i32 -> vector<8x128xf32>
    %c126_i32_54 = arith.constant 126 : i32
    %71 = tpu.dynamic_rotate %65 by %c126_i32_54 dim 1 : vector<8x128xf32>, i32 -> vector<8x128xf32>
    %c125_i32_55 = arith.constant 125 : i32
    %72 = tpu.dynamic_rotate %65 by %c125_i32_55 dim 1 : vector<8x128xf32>, i32 -> vector<8x128xf32>
    %c124_i32_56 = arith.constant 124 : i32
    %73 = tpu.dynamic_rotate %65 by %c124_i32_56 dim 1 : vector<8x128xf32>, i32 -> vector<8x128xf32>
    %74 = tpu.concatenate %66, %67, %68, %69, %65, %70, %71, %72, %73 in 0 : vector<8x128xf32>, vector<8x128xf32>, vector<8x128xf32>, vector<8x128xf32>, vector<8x128xf32>, vector<8x128xf32>, vector<8x128xf32>, vector<8x128xf32>, vector<8x128xf32> -> vector<72x128xf32>
    %cst_57 = arith.constant dense<0.000000e+00> : vector<8x128xf32>
    %75 = tpu.matmul %63, %74, %cst_57 {dimension_numbers = #tpu.dot_dimension_numbers<[1], [0], [0], [1], [0, 0, 1, 1], [], []>} : vector<8x72xf32>, vector<72x128xf32>, vector<8x128xf32> -> vector<8x128xf32>
    %c0_58 = arith.constant 0 : index
    %c0_59 = arith.constant 0 : index
    %76 = vector.load %arg13[%c0_58, %c0_59] : memref<8x32xf32, #tpu.memory_space<vmem>>, vector<8x32xf32>
    %77 = vector.broadcast %1 : vector<1x128xf32> to vector<8x128xf32>
    %78 = arith.mulf %75, %77 : vector<8x128xf32>
    %c1_i32_60 = arith.constant 1 : i32
    %79 = tpu.dynamic_rotate %78 by %c1_i32_60 dim 1 : vector<8x128xf32>, i32 -> vector<8x128xf32>
    %c127_i32_61 = arith.constant 127 : i32
    %80 = tpu.dynamic_rotate %78 by %c127_i32_61 dim 1 : vector<8x128xf32>, i32 -> vector<8x128xf32>
    %c126_i32_62 = arith.constant 126 : i32
    %81 = tpu.dynamic_rotate %78 by %c126_i32_62 dim 1 : vector<8x128xf32>, i32 -> vector<8x128xf32>
    %82 = tpu.concatenate %79, %78, %80, %81 in 0 : vector<8x128xf32>, vector<8x128xf32>, vector<8x128xf32>, vector<8x128xf32> -> vector<32x128xf32>
    %cst_63 = arith.constant dense<0.000000e+00> : vector<8x128xf32>
    %83 = tpu.matmul %76, %82, %cst_63 {dimension_numbers = #tpu.dot_dimension_numbers<[1], [0], [0], [1], [0, 0, 1, 1], [], []>} : vector<8x32xf32>, vector<32x128xf32>, vector<8x128xf32> -> vector<8x128xf32>
    %c0_64 = arith.constant 0 : index
    %c0_65 = arith.constant 0 : index
    %84 = vector.load %arg14[%c0_64, %c0_65] : memref<8x16xf32, #tpu.memory_space<vmem>>, vector<8x16xf32>
    %85 = vector.broadcast %1 : vector<1x128xf32> to vector<8x128xf32>
    %86 = arith.mulf %83, %85 : vector<8x128xf32>
    %c127_i32_66 = arith.constant 127 : i32
    %87 = tpu.dynamic_rotate %86 by %c127_i32_66 dim 1 : vector<8x128xf32>, i32 -> vector<8x128xf32>
    %88 = tpu.concatenate %86, %87 in 0 : vector<8x128xf32>, vector<8x128xf32> -> vector<16x128xf32>
    %cst_67 = arith.constant dense<0.000000e+00> : vector<8x128xf32>
    %89 = tpu.matmul %84, %88, %cst_67 {dimension_numbers = #tpu.dot_dimension_numbers<[1], [0], [0], [1], [0, 0, 1, 1], [], []>} : vector<8x16xf32>, vector<16x128xf32>, vector<8x128xf32> -> vector<8x128xf32>
    %c0_68 = arith.constant 0 : index
    %c0_69 = arith.constant 0 : index
    %90 = vector.load %arg16[%c0_68, %c0_69] : memref<8x1xf32, #tpu.memory_space<vmem>>, vector<8x1xf32>
    %c0_70 = arith.constant 0 : index
    %c0_71 = arith.constant 0 : index
    %91 = vector.load %arg17[%c0_70, %c0_71] : memref<8x1xf32, #tpu.memory_space<vmem>>, vector<8x1xf32>
    %c0_72 = arith.constant 0 : index
    %c0_73 = arith.constant 0 : index
    %92 = vector.load %arg15[%c0_72, %c0_73] : memref<8x8xf32, #tpu.memory_space<vmem>>, vector<8x8xf32>
    %cst_74 = arith.constant dense<0.000000e+00> : vector<8x128xf32>
    %93 = tpu.matmul %92, %60, %cst_74 {dimension_numbers = #tpu.dot_dimension_numbers<[1], [0], [0], [1], [0, 0, 1, 1], [], []>} : vector<8x8xf32>, vector<8x128xf32>, vector<8x128xf32> -> vector<8x128xf32>
    %94 = vector.broadcast %1 : vector<1x128xf32> to vector<8x128xf32>
    %95 = arith.mulf %93, %94 : vector<8x128xf32>
    %cst_75 = arith.constant dense<0.000000e+00> : vector<8xf32>
    %96 = vector.multi_reduction <add>, %95, %cst_75 [1] : vector<8x128xf32> to vector<8xf32>
    %97 = vector.shape_cast %96 : vector<8xf32> to vector<8x1xf32>
    %cst_76 = arith.constant 3.125000e-02 : f32
    %98 = vector.broadcast %cst_76 : f32 to vector<8x1xf32>
    %99 = arith.mulf %97, %98 : vector<8x1xf32>
    %100 = vector.broadcast %99 : vector<8x1xf32> to vector<8x128xf32>
    %101 = arith.subf %95, %100 : vector<8x128xf32>
    %102 = vector.broadcast %1 : vector<1x128xf32> to vector<8x128xf32>
    %103 = arith.mulf %101, %102 : vector<8x128xf32>
    %104 = arith.mulf %103, %103 : vector<8x128xf32>
    %cst_77 = arith.constant dense<0.000000e+00> : vector<8xf32>
    %105 = vector.multi_reduction <add>, %104, %cst_77 [1] : vector<8x128xf32> to vector<8xf32>
    %106 = vector.shape_cast %105 : vector<8xf32> to vector<8x1xf32>
    %cst_78 = arith.constant 3.125000e-02 : f32
    %107 = vector.broadcast %cst_78 : f32 to vector<8x1xf32>
    %108 = arith.mulf %106, %107 : vector<8x1xf32>
    %cst_79 = arith.constant 9.99999974E-6 : f32
    %109 = vector.broadcast %cst_79 : f32 to vector<8x1xf32>
    %110 = arith.addf %108, %109 : vector<8x1xf32>
    %111 = math.rsqrt %110 : vector<8x1xf32>
    %112 = vector.broadcast %111 : vector<8x1xf32> to vector<8x128xf32>
    %113 = arith.mulf %101, %112 : vector<8x128xf32>
    %114 = vector.broadcast %90 : vector<8x1xf32> to vector<8x128xf32>
    %115 = arith.mulf %113, %114 : vector<8x128xf32>
    %116 = vector.broadcast %91 : vector<8x1xf32> to vector<8x128xf32>
    %117 = arith.addf %115, %116 : vector<8x128xf32>
    %cst_80 = arith.constant 0.000000e+00 : f32
    %118 = vector.broadcast %cst_80 : f32 to vector<8x128xf32>
    %119 = arith.maximumf %117, %118 : vector<8x128xf32>
    %120 = arith.addf %89, %119 : vector<8x128xf32>
    %c0_81 = arith.constant 0 : index
    %c0_82 = arith.constant 0 : index
    %121 = vector.load %arg18[%c0_81, %c0_82] : memref<128x8xf32, #tpu.memory_space<vmem>>, vector<128x8xf32>
    %c0_83 = arith.constant 0 : index
    %c0_84 = arith.constant 0 : index
    %122 = vector.load %arg19[%c0_83, %c0_84] : memref<1x128xf32, #tpu.memory_space<vmem>>, vector<1x128xf32>
    %cst_85 = arith.constant dense<0.000000e+00> : vector<128x128xf32>
    %123 = tpu.matmul %121, %120, %cst_85 {dimension_numbers = #tpu.dot_dimension_numbers<[1], [0], [0], [1], [0, 0, 1, 1], [], []>} : vector<128x8xf32>, vector<8x128xf32>, vector<128x128xf32> -> vector<128x128xf32>
    %cst_86 = arith.constant dense<0.000000e+00> : vector<2x128xf32>
    %124 = tpu.matmul %2, %123, %cst_86 {dimension_numbers = #tpu.dot_dimension_numbers<[1], [1], [0], [0], [0, 0, 1, 0], [], []>} : vector<2x128xf32>, vector<128x128xf32>, vector<2x128xf32> -> vector<2x128xf32>
    %125 = vector.broadcast %122 : vector<1x128xf32> to vector<2x128xf32>
    %126 = arith.addf %124, %125 : vector<2x128xf32>
    %c0_87 = arith.constant 0 : index
    %c0_88 = arith.constant 0 : index
    %127 = vector.load %arg20[%c0_87, %c0_88] : memref<2x128xf32, #tpu.memory_space<vmem>>, vector<2x128xf32>
    tpu.vector_store %arg20[%c0_87, %c0_88], %126 {strides = array<i32>} : memref<2x128xf32, #tpu.memory_space<vmem>>, vector<2x128xf32>,
    return
  }
}

</mosaic_0001>

<bundles_post_ra>
// kernel: tpu_custom_call.1
= control target key start
LH: loop header
LB: loop body
LE: loop exit
PB: predicated region body
PF: predicated region fallthrough
CT: control target
= control target key end

     0   :  { %s2214_s0 = inlined_call_operand.vmem [shape: f32[8,128], index: 0, kind: input, shape index: {}]   ;;  %s2215_s1 = inlined_call_operand.vmem [shape: f32[1,128], index: 1, kind: input, shape index: {}]   ;;  %s2216_s2 = inlined_call_operand.vmem [shape: f32[2,128], index: 2, kind: input, shape index: {}]   ;;  %s2217_s3 = inlined_call_operand.vmem [shape: f32[8,8], index: 3, kind: input, shape index: {}]   ;;  %s2218_s4 = inlined_call_operand.vmem [shape: f32[8,72], index: 4, kind: input, shape index: {}]   ;;  %s2219_s5 = inlined_call_operand.vmem [shape: f32[8,32], index: 5, kind: input, shape index: {}]   ;;  %s2220_s6 = inlined_call_operand.vmem [shape: f32[8,16], index: 6, kind: input, shape index: {}]   ;;  %s2221_s7 = inlined_call_operand.vmem [shape: f32[8,8], index: 7, kind: input, shape index: {}]   ;;  %s2222_s8 = inlined_call_operand.vmem [shape: f32[8,72], index: 8, kind: input, shape index: {}]   ;;  %s2223_s9 = inlined_call_operand.vmem [shape: f32[8,32], index: 9, kind: input, shape index: {}]   ;;  %s2224_s10 = inlined_call_operand.vmem [shape: f32[8,16], index: 10, kind: input, shape index: {}]   ;;  %s2225_s11 = inlined_call_operand.vmem [shape: f32[8,8], index: 11, kind: input, shape index: {}]   ;;  %s2226_s12 = inlined_call_operand.vmem [shape: f32[8,72], index: 12, kind: input, shape index: {}]   ;;  %s2227_s13 = inlined_call_operand.vmem [shape: f32[8,32], index: 13, kind: input, shape index: {}]   ;;  %s2228_s14 = inlined_call_operand.vmem [shape: f32[8,16], index: 14, kind: input, shape index: {}]   ;;  %s2229_s15 = inlined_call_operand.vmem [shape: f32[8,8], index: 15, kind: input, shape index: {}]   ;;  %s2230_s16 = inlined_call_operand.vmem [shape: f32[8,1], index: 16, kind: input, shape index: {}]   ;;  %s2231_s17 = inlined_call_operand.vmem [shape: f32[8,1], index: 17, kind: input, shape index: {}]   ;;  %s2232_s18 = inlined_call_operand.vmem [shape: f32[128,8], index: 18, kind: input, shape index: {}]   ;;  %s2233_s19 = inlined_call_operand.vmem [shape: f32[1,128], index: 19, kind: input, shape index: {}]   ;;  %s2234_s20 = inlined_call_operand.hbm [shape: f32[2,128], index: 20, kind: output, shape index: {}]  }
   0x1   :  { %2235 = sst [smem:[#allocation5_spill]] %s2214_s0 }
   0x2   :  { %2236 = sst [smem:[#allocation6_spill]] %s2215_s1 }
   0x3   :  { %2237 = sst [smem:[#allocation7_spill]] %s2216_s2 }
   0x4   :  { %2238 = sst [smem:[#allocation8_spill]] %s2217_s3 }
   0x5   :  { %2239 = sst [smem:[#allocation9_spill]] %s2218_s4 }
   0x6   :  { %2240 = sst [smem:[#allocation10_spill]] %s2228_s14 }
   0x7   :  { %s2241_s23 = sld [smem:[#allocation5_spill]]  ;;  %vm70_vm0 = vcmask 64512   ;;  %v1814_v2 = vmov 0.0   ;;  %vm1815_vm1 = vmmov 0  }
   0x8   :  { %s2242_s14 = sld [smem:[#allocation8_spill]]  ;;  %1578 = vmatprep.subr.mxu1 %v1814_v2  ;;  %1580 = vmatprep.mubr.msk.f32.mxu1 %vm1815_vm1, %v1814_v2 }
   0xd   :  { %v66_v0 = vld [vmem:[%s2241_s23] sm:$0xff] }
   0xe   :  { %v69_v1 = vld [vmem:[%s2242_s14] sm:$0xff] }
   0xf   :  { %25 = vsyncpa [#allocation3], 0  ;;  %1579 = vmatpush3.msra.mxu1 %v66_v0  ;;  %1583 = vmatprep.subr.mxu0 %v1814_v2  ;;  %s2243_s3 = sld [smem:[#allocation6_spill]]  ;;  %s1816_s26 = smov 126   ;;  %vm168_vm2 = vcmask 588800   ;;  %v242_v21 = vld [vmem:[%s2219_s5] sm:$0xff] }
  0x10   :  { %1581 = vmatmul.mubr.msk.f32.vlgmr.msra.gmra.mxu1 %vm70_vm0, %v69_v1  ;;  %1601 = vmatprep.mubr.msk.f32.mxu0 %vm1815_vm1, %v1814_v2  ;;  %s1817_s27 = smov 124   ;;  %s1818_s28 = smov 127   ;;  %vm250_vm3 = vcmask 261120   ;;  %v324_v27 = vld [vmem:[%s2220_s6] sm:$0xff]  ;;  %vm328_vm4 = vcmask 130048  }
  0x11   :  { %1648 = vmatprep.subr.mxu1 %v1814_v2  ;;  %1656 = vmatprep.mubr.msk.f32.mxu1 %vm1815_vm1, %v1814_v2  ;;  %s1819_s4 = smov 125   ;;  %s1820_s29 = smov 2   ;;  %v402_v28 = vld [vmem:[%s2221_s7] sm:$0xff] }
  0x12   :  { %s1821_s30 = smov 1   ;;  %s1822_s0 = smov 4   ;;  %v476_v41 = vld [vmem:[%s2222_s8] sm:$0xff] }
  0x13   :  { %s1823_s21 = smov 3   ;;  %s2244_s23 = sld [smem:[#allocation9_spill]]  ;;  %v567_v48 = vld [vmem:[%s2223_s9] sm:$0xff] }
  0x14   :  { %v648_v54 = vld [vmem:[%s2224_s10] sm:$0xff]  ;;  %s2246_s25 = sld [smem:[#allocation7_spill]]  ;;  %s1825_s7 = smov [#allocation2]  }
  0x15   :  { %v1950_v3 = vld [vmem:[%s2243_s3] ss:$0 sm:$0xff]  ;;  %s1443_s8 = sshll.u32 %s1825_s7, 4  ;;  %s1444_s8 = int_to_ptr.vmem [resolvable:$true] %s1443_s8 }
  0x16   :  { %v725_v55 = vld [vmem:[%s2225_s11] sm:$0xff]  ;;  %s1792_s1 = scalar_lea.vmem %s1444_s8, 32  ;;  %p1797_p1 = scmp.lt.s32.totalorder %s1444_s8, %s1444_s8 }
  0x17   :  { %p1793_p0 = scmp.ne.s32.totalorder %s1444_s8, %s1792_s1  ;;  %p1798_p2 = scmp.lt.s32.totalorder %s1792_s1, %s1792_s1 }
  0x19   :  { %v144_v14 = vld [vmem:[%s2244_s23] sm:$0xff]  ;;  %p1799_p3 = por %p1798_p2, %p1797_p1 }
  0x1b   :  { %p1800_p4 = pnand %p1799_p3, %p1793_p0 }
  0xd0   :  { %v140_v4 = vpop.f32.mrf.mxu1 }
  0xd1   :  { %v151_v5 = vmul.f32 %v1950_v3, %v140_v4 }
  0xd2   :  { %v1582_v6 = vpop.f32.mrf.mxu1 }
  0xd3   :  { %162 = vrot.lane.b32.xlu1 %v151_v5, %s1816_s26  ;;  %166 = vrot.lane.b32.xlu0 %v151_v5, %s1817_s27  ;;  %v799_v6 = vld [vmem:[%s2226_s12] sm:$0xff] }
  0xd7   :  { %160 = vrot.lane.b32.xlu1 %v151_v5, %s1818_s28  ;;  %164 = vrot.lane.b32.xlu0 %v151_v5, %s1819_s4 }
  0xdb   :  { %156 = vrot.lane.b32.xlu1 %v151_v5, %s1820_s29  ;;  %158 = vrot.lane.b32.xlu0 %v151_v5, %s1821_s30 }
  0xdf   :  { %152 = vrot.lane.b32.xlu1 %v151_v5, %s1822_s0  ;;  %154 = vrot.lane.b32.xlu0 %v151_v5, %s1823_s21 }
 0x145   :  { %v163_v7 = vpop.permute.xlu1 %162  ;;  %v167_v8 = vpop.permute.xlu0 %166 }
 0x146   :  { %1584 = vmatpush3.msra.mxu0 %v167_v8 }
 0x147   :  { %1585 = vmatprep.subr.mxu0 %v1814_v2 }
 0x149   :  { %v165_v9 = vpop.permute.xlu0 %164  ;;  %v161_v10 = vpop.permute.xlu1 %160 }
 0x14a   :  { %1586 = vmatpush3.msra.mxu0 %v165_v9 }
 0x14b   :  { %1587 = vmatprep.subr.mxu0 %v1814_v2 }
 0x14c   :  { %1588 = vmatpush3.msra.mxu0 %v163_v7 }
 0x14d   :  { %1589 = vmatprep.subr.mxu0 %v1814_v2  ;;  %v159_v11 = vpop.permute.xlu0 %158  ;;  %v157_v12 = vpop.permute.xlu1 %156 }
 0x14e   :  { %1590 = vmatpush3.msra.mxu0 %v161_v10 }
 0x14f   :  { %1591 = vmatprep.subr.mxu0 %v1814_v2 }
 0x150   :  { %1592 = vmatpush3.msra.mxu0 %v151_v5 }
 0x151   :  { %1593 = vmatprep.subr.mxu0 %v1814_v2  ;;  %v155_v13 = vpop.permute.xlu0 %154  ;;  %v153_v15 = vpop.permute.xlu1 %152 }
 0x152   :  { %1594 = vmatpush3.msra.mxu0 %v159_v11 }
 0x153   :  { %1595 = vmatprep.subr.mxu0 %v1814_v2 }
 0x154   :  { %1596 = vmatpush3.msra.mxu0 %v157_v12 }
 0x155   :  { %1597 = vmatprep.subr.mxu0 %v1814_v2 }
 0x156   :  { %1598 = vmatpush3.msra.mxu0 %v155_v13  ;;  %v890_v13 = vld [vmem:[%s2227_s13] sm:$0xff] }
 0x157   :  { %1599 = vmatprep.subr.mxu0 %v1814_v2 }
 0x158   :  { %1600 = vmatpush3.msra.mxu0 %v153_v15  ;;  %v977_v15 = vld [vmem:[%s2229_s15] sm:$0xff] }
 0x159   :  { %1602 = vmatmul.mubr.msk.f32.vlgmr.msra.gmra.mxu0 %vm168_vm2, %v144_v14  ;;  %1604 = vmatprep.subr.mxu0 %v1814_v2 }
 0x15a   :  { %1612 = vmatprep.mubr.msk.f32.mxu0 %vm1815_vm1, %v1814_v2 }
 0x219   :  { %v238_v16 = vpop.f32.mrf.mxu0 }
 0x21a   :  { %v243_v17 = vmul.f32 %v1950_v3, %v238_v16 }
 0x21b   :  { %v1603_v18 = vpop.f32.mrf.mxu0 }
 0x21c   :  { %246 = vrot.lane.b32.xlu1 %v243_v17, %s1818_s28  ;;  %248 = vrot.lane.b32.xlu0 %v243_v17, %s1816_s26 }
 0x220   :  { %244 = vrot.lane.b32.xlu0 %v243_v17, %s1821_s30 }
 0x28e   :  { %v249_v19 = vpop.permute.xlu0 %248  ;;  %v247_v20 = vpop.permute.xlu1 %246 }
 0x28f   :  { %1605 = vmatpush3.msra.mxu0 %v249_v19 }
 0x290   :  { %1606 = vmatprep.subr.mxu0 %v1814_v2 }
 0x291   :  { %1607 = vmatpush3.msra.mxu0 %v247_v20 }
 0x292   :  { %1608 = vmatprep.subr.mxu0 %v1814_v2  ;;  %v245_v22 = vpop.permute.xlu0 %244 }
 0x293   :  { %1609 = vmatpush3.msra.mxu0 %v243_v17 }
 0x294   :  { %1610 = vmatprep.subr.mxu0 %v1814_v2 }
 0x295   :  { %1611 = vmatpush3.msra.mxu0 %v245_v22  ;;  %v1824_v22 = vmov 0  }
 0x296   :  { %1613 = vmatmul.mubr.msk.f32.vlgmr.msra.gmra.mxu0 %vm250_vm3, %v242_v21  ;;  %1615 = vmatprep.subr.mxu0 %v1814_v2 }
 0x297   :  { %1619 = vmatprep.mubr.msk.f32.mxu0 %vm1815_vm1, %v1814_v2  ;;  %1788 = vset.pattern.permute.xlu0 %v1824_v22 }
 0x298   :  { %1789 = vset.pattern.permute.xlu1 %v1824_v22 }
 0x356   :  { %v320_v23 = vpop.f32.mrf.mxu0 }
 0x357   :  { %v325_v24 = vmul.f32 %v1950_v3, %v320_v23  ;;  %v975_v23 = vld [vmem:[%s2230_s16] sm:$0xff] }
 0x358   :  { %v1614_v25 = vpop.f32.mrf.mxu0 }
 0x359   :  { %326 = vrot.lane.b32.xlu1 %v325_v24, %s1818_s28 }
 0x3cb   :  { %v327_v26 = vpop.permute.xlu1 %326 }
 0x3cc   :  { %1616 = vmatpush3.msra.mxu0 %v327_v26 }
 0x3cd   :  { %1617 = vmatprep.subr.mxu0 %v1814_v2 }
 0x3ce   :  { %1618 = vmatpush3.msra.mxu0 %v325_v24 }
 0x3cf   :  { %1620 = vmatmul.mubr.msk.f32.vlgmr.msra.gmra.mxu0 %vm328_vm4, %v324_v27  ;;  %1622 = vmatprep.subr.mxu0 %v1814_v2 }
 0x3d0   :  { %1624 = vmatprep.mubr.msk.f32.mxu0 %vm1815_vm1, %v1814_v2 }
 0x48f   :  { %v398_v29 = vpop.f32.mrf.mxu0 }
 0x490   :  { %1623 = vmatpush3.msra.mxu0 %v398_v29 }
 0x491   :  { %v1621_v30 = vpop.f32.mrf.mxu0  ;;  %1625 = vmatmul.mubr.msk.f32.vlgmr.msra.gmra.mxu0 %vm70_vm0, %v402_v28  ;;  %1627 = vmatprep.subr.mxu0 %v1814_v2 }
 0x492   :  { %1645 = vmatprep.mubr.msk.f32.mxu0 %vm1815_vm1, %v1814_v2 }
 0x551   :  { %v472_v31 = vpop.f32.mrf.mxu0 }
 0x552   :  { %v477_v32 = vmul.f32 %v1950_v3, %v472_v31  ;;  %v976_v31 = vld [vmem:[%s2231_s17] sm:$0xff] }
 0x553   :  { %v1626_v33 = vpop.f32.mrf.mxu0 }
 0x554   :  { %490 = vrot.lane.b32.xlu1 %v477_v32, %s1819_s4  ;;  %492 = vrot.lane.b32.xlu0 %v477_v32, %s1817_s27 }
 0x558   :  { %486 = vrot.lane.b32.xlu1 %v477_v32, %s1818_s28  ;;  %488 = vrot.lane.b32.xlu0 %v477_v32, %s1816_s26 }
 0x55c   :  { %482 = vrot.lane.b32.xlu1 %v477_v32, %s1820_s29  ;;  %484 = vrot.lane.b32.xlu0 %v477_v32, %s1821_s30 }
 0x560   :  { %478 = vrot.lane.b32.xlu1 %v477_v32, %s1822_s0  ;;  %480 = vrot.lane.b32.xlu0 %v477_v32, %s1823_s21 }
 0x5c6   :  { %v491_v34 = vpop.permute.xlu1 %490  ;;  %v493_v35 = vpop.permute.xlu0 %492 }
 0x5c7   :  { %1628 = vmatpush3.msra.mxu0 %v493_v35 }
 0x5c8   :  { %1629 = vmatprep.subr.mxu0 %v1814_v2 }
 0x5c9   :  { %1630 = vmatpush3.msra.mxu0 %v491_v34 }
 0x5ca   :  { %v487_v36 = vpop.permute.xlu1 %486  ;;  %1631 = vmatprep.subr.mxu0 %v1814_v2  ;;  %v489_v37 = vpop.permute.xlu0 %488 }
 0x5cb   :  { %1632 = vmatpush3.msra.mxu0 %v489_v37 }
 0x5cc   :  { %1633 = vmatprep.subr.mxu0 %v1814_v2 }
 0x5cd   :  { %1634 = vmatpush3.msra.mxu0 %v487_v36 }
 0x5ce   :  { %1635 = vmatprep.subr.mxu0 %v1814_v2  ;;  %v485_v38 = vpop.permute.xlu0 %484  ;;  %v483_v39 = vpop.permute.xlu1 %482 }
 0x5cf   :  { %1636 = vmatpush3.msra.mxu0 %v477_v32  ;;  %v1150_v32 = vld [vmem:[%s2232_s18] sm:$0xff] }
 0x5d0   :  { %1637 = vmatprep.subr.mxu0 %v1814_v2 }
 0x5d1   :  { %1638 = vmatpush3.msra.mxu0 %v485_v38 }
 0x5d2   :  { %1639 = vmatprep.subr.mxu0 %v1814_v2  ;;  %v481_v40 = vpop.permute.xlu0 %480  ;;  %v479_v42 = vpop.permute.xlu1 %478 }
 0x5d3   :  { %1640 = vmatpush3.msra.mxu0 %v483_v39 }
 0x5d4   :  { %1641 = vmatprep.subr.mxu0 %v1814_v2 }
 0x5d5   :  { %1642 = vmatpush3.msra.mxu0 %v481_v40 }
 0x5d6   :  { %1643 = vmatprep.subr.mxu0 %v1814_v2 }
 0x5d7   :  { %1644 = vmatpush3.msra.mxu0 %v479_v42 }
 0x5d8   :  { %1646 = vmatmul.mubr.msk.f32.vlgmr.msra.gmra.mxu0 %vm168_vm2, %v476_v41  ;;  %1692 = vmatprep.subr.mxu0 %v1814_v2 }
 0x5d9   :  { %1700 = vmatprep.mubr.msk.f32.mxu0 %vm1815_vm1, %v1814_v2 }
 0x698   :  { %v563_v43 = vpop.f32.mrf.mxu0 }
 0x699   :  { %v568_v44 = vmul.f32 %v1950_v3, %v563_v43 }
 0x69a   :  { %v1647_v45 = vpop.f32.mrf.mxu0 }
 0x69b   :  { %571 = vrot.lane.b32.xlu1 %v568_v44, %s1818_s28  ;;  %573 = vrot.lane.b32.xlu0 %v568_v44, %s1816_s26  ;;  %v1151_v45 = vld [vmem:[%s2232_s18 + $0x8] sm:$0xff] }
 0x69f   :  { %569 = vrot.lane.b32.xlu0 %v568_v44, %s1821_s30 }
 0x70d   :  { %v574_v46 = vpop.permute.xlu0 %573  ;;  %v572_v47 = vpop.permute.xlu1 %571 }
 0x70e   :  { %1649 = vmatpush3.msra.mxu1 %v574_v46  ;;  %v1152_v46 = vld [vmem:[%s2232_s18 + $0x10] sm:$0xff] }
 0x70f   :  { %1650 = vmatprep.subr.mxu1 %v1814_v2 }
 0x710   :  { %1651 = vmatpush3.msra.mxu1 %v572_v47  ;;  %v1153_v47 = vld [vmem:[%s2232_s18 + $0x18] sm:$0xff] }
 0x711   :  { %1652 = vmatprep.subr.mxu1 %v1814_v2  ;;  %v570_v49 = vpop.permute.xlu0 %569 }
 0x712   :  { %1653 = vmatpush3.msra.mxu1 %v568_v44 }
 0x713   :  { %1654 = vmatprep.subr.mxu1 %v1814_v2 }
 0x714   :  { %1655 = vmatpush3.msra.mxu1 %v570_v49  ;;  %v1155_v49 = vld [vmem:[%s2232_s18 + $0x28] sm:$0xff] }
 0x715   :  { %1657 = vmatmul.mubr.msk.f32.vlgmr.msra.gmra.mxu1 %vm250_vm3, %v567_v48  ;;  %1659 = vmatprep.subr.mxu1 %v1814_v2  ;;  %v1154_v48 = vld [vmem:[%s2232_s18 + $0x20] sm:$0xff] }
 0x716   :  { %1663 = vmatprep.mubr.msk.f32.mxu1 %vm1815_vm1, %v1814_v2 }
 0x7d5   :  { %v644_v50 = vpop.f32.mrf.mxu1 }
 0x7d6   :  { %v649_v51 = vmul.f32 %v1950_v3, %v644_v50  ;;  %v1156_v50 = vld [vmem:[%s2232_s18 + $0x30] sm:$0xff] }
 0x7d7   :  { %v1658_v52 = vpop.f32.mrf.mxu1 }
 0x7d8   :  { %650 = vrot.lane.b32.xlu1 %v649_v51, %s1818_s28  ;;  %v1158_v52 = vld [vmem:[%s2232_s18 + $0x40] sm:$0xff] }
 0x84a   :  { %v651_v53 = vpop.permute.xlu1 %650 }
 0x84b   :  { %1660 = vmatpush3.msra.mxu1 %v651_v53  ;;  %v1159_v53 = vld [vmem:[%s2232_s18 + $0x48] sm:$0xff] }
 0x84c   :  { %1661 = vmatprep.subr.mxu1 %v1814_v2 }
 0x84d   :  { %1662 = vmatpush3.msra.mxu1 %v649_v51  ;;  %v1157_v51 = vld [vmem:[%s2232_s18 + $0x38] sm:$0xff] }
 0x84e   :  { %1664 = vmatmul.mubr.msk.f32.vlgmr.msra.gmra.mxu1 %vm328_vm4, %v648_v54  ;;  %1666 = vmatprep.subr.mxu1 %v1814_v2  ;;  %v1160_v54 = vld [vmem:[%s2232_s18 + $0x50] sm:$0xff] }
 0x84f   :  { %1668 = vmatprep.mubr.msk.f32.mxu1 %vm1815_vm1, %v1814_v2 }
 0x90e   :  { %v2058_v56 = vpop.f32.mrf.mxu1 }
 0x90f   :  { %1667 = vmatpush3.msra.mxu1 %v2058_v56 }
 0x910   :  { %v1665_v57 = vpop.f32.mrf.mxu1  ;;  %1669 = vmatmul.mubr.msk.f32.vlgmr.msra.gmra.mxu1 %vm70_vm0, %v725_v55  ;;  %1671 = vmatprep.subr.mxu1 %v1814_v2  ;;  %v1161_v55 = vld [vmem:[%s2232_s18 + $0x58] sm:$0xff] }
 0x911   :  { %1689 = vmatprep.mubr.msk.f32.mxu1 %vm1815_vm1, %v1814_v2  ;;  %v1163_v57 = vld [vmem:[%s2232_s18 + $0x68] sm:$0xff] }
 0x9d0   :  { %v795_v58 = vpop.f32.mrf.mxu1 }
 0x9d1   :  { %v800_v59 = vmul.f32 %v1950_v3, %v795_v58  ;;  %v1164_v58 = vld [vmem:[%s2232_s18 + $0x70] sm:$0xff] }
 0x9d2   :  { %v1670_v60 = vpop.f32.mrf.mxu1 }
 0x9d3   :  { %813 = vrot.lane.b32.xlu1 %v800_v59, %s1819_s4  ;;  %815 = vrot.lane.b32.xlu0 %v800_v59, %s1817_s27 }
 0x9d7   :  { %809 = vrot.lane.b32.xlu1 %v800_v59, %s1818_s28  ;;  %811 = vrot.lane.b32.xlu0 %v800_v59, %s1816_s26 }
 0x9db   :  { %805 = vrot.lane.b32.xlu1 %v800_v59, %s1820_s29  ;;  %807 = vrot.lane.b32.xlu0 %v800_v59, %s1821_s30 }
 0x9df   :  { %801 = vrot.lane.b32.xlu1 %v800_v59, %s1822_s0  ;;  %803 = vrot.lane.b32.xlu0 %v800_v59, %s1823_s21  ;;  %s2245_s0 = sld [smem:[#allocation10_spill]] }
 0x9e5   :  { %v971_v25 = vld [vmem:[%s2245_s0] sm:$0xff] }
 0xa45   :  { %v814_v61 = vpop.permute.xlu1 %813  ;;  %v816_v62 = vpop.permute.xlu0 %815 }
 0xa46   :  { %1672 = vmatpush3.msra.mxu1 %v816_v62 }
 0xa47   :  { %1673 = vmatprep.subr.mxu1 %v1814_v2 }
 0xa48   :  { %1674 = vmatpush3.msra.mxu1 %v814_v61 }
 0xa49   :  { %v810_v63 = vpop.permute.xlu1 %809  ;;  %1675 = vmatprep.subr.mxu1 %v1814_v2  ;;  %v812_v0 = vpop.permute.xlu0 %811 }
 0xa4a   :  { %1676 = vmatpush3.msra.mxu1 %v812_v0 }
 0xa4b   :  { %1677 = vmatprep.subr.mxu1 %v1814_v2 }
 0xa4c   :  { %1678 = vmatpush3.msra.mxu1 %v810_v63 }
 0xa4d   :  { %1679 = vmatprep.subr.mxu1 %v1814_v2  ;;  %v808_v1 = vpop.permute.xlu0 %807  ;;  %v806_v4 = vpop.permute.xlu1 %805 }
 0xa4e   :  { %1680 = vmatpush3.msra.mxu1 %v800_v59  ;;  %v1165_v59 = vld [vmem:[%s2232_s18 + $0x78] sm:$0xff] }
 0xa4f   :  { %1681 = vmatprep.subr.mxu1 %v1814_v2 }
 0xa50   :  { %1682 = vmatpush3.msra.mxu1 %v808_v1 }
 0xa51   :  { %1683 = vmatprep.subr.mxu1 %v1814_v2  ;;  %v804_v5 = vpop.permute.xlu0 %803  ;;  %v802_v7 = vpop.permute.xlu1 %801 }
 0xa52   :  { %1684 = vmatpush3.msra.mxu1 %v806_v4 }
 0xa53   :  { %1685 = vmatprep.subr.mxu1 %v1814_v2 }
 0xa54   :  { %1686 = vmatpush3.msra.mxu1 %v804_v5 }
 0xa55   :  { %1687 = vmatprep.subr.mxu1 %v1814_v2 }
 0xa56   :  { %1688 = vmatpush3.msra.mxu1 %v802_v7 }
 0xa57   :  { %1690 = vmatmul.mubr.msk.f32.vlgmr.msra.gmra.mxu1 %vm168_vm2, %v799_v6  ;;  %1741 = vmatprep.subr.mxu1 %v1814_v2 }
 0xa58   :  { %1773 = vmatprep.mubr.msk.f32.mxu1 %vm1815_vm1, %v1814_v2 }
 0xb17   :  { %v886_v8 = vpop.f32.mrf.mxu1 }
 0xb18   :  { %v891_v9 = vmul.f32 %v1950_v3, %v886_v8 }
 0xb19   :  { %v1691_v10 = vpop.f32.mrf.mxu1 }
 0xb1a   :  { %894 = vrot.lane.b32.xlu1 %v891_v9, %s1818_s28  ;;  %896 = vrot.lane.b32.xlu0 %v891_v9, %s1816_s26 }
 0xb1e   :  { %892 = vrot.lane.b32.xlu0 %v891_v9, %s1821_s30 }
 0xb8c   :  { %v897_v11 = vpop.permute.xlu0 %896  ;;  %v895_v12 = vpop.permute.xlu1 %894 }
 0xb8d   :  { %1693 = vmatpush3.msra.mxu0 %v897_v11 }
 0xb8e   :  { %1694 = vmatprep.subr.mxu0 %v1814_v2 }
 0xb8f   :  { %1695 = vmatpush3.msra.mxu0 %v895_v12 }
 0xb90   :  { %1696 = vmatprep.subr.mxu0 %v1814_v2  ;;  %v893_v14 = vpop.permute.xlu0 %892 }
 0xb91   :  { %1697 = vmatpush3.msra.mxu0 %v891_v9 }
 0xb92   :  { %1698 = vmatprep.subr.mxu0 %v1814_v2 }
 0xb93   :  { %1699 = vmatpush3.msra.mxu0 %v893_v14  ;;  %v68_v14 = vld [vmem:[%s2246_s25] sm:$0x3] }
 0xb94   :  { %1701 = vmatmul.mubr.msk.f32.vlgmr.msra.gmra.mxu0 %vm250_vm3, %v890_v13  ;;  %1703 = vmatprep.subr.mxu0 %v1814_v2 }
 0xb95   :  { %1704 = vmatpush3.msra.mxu0 %v2058_v56  ;;  %1705 = vmatprep.mubr.msk.f32.mxu0 %vm1815_vm1, %v1814_v2  ;;  %v1162_v56 = vld [vmem:[%s2232_s18 + $0x60] sm:$0xff] }
 0xb96   :  { %1708 = vmatprep.subr.mxu0 %v1814_v2 }
 0xb98   :  { %1706 = vmatmul.mubr.msk.f32.vlgmr.msra.gmra.mxu0 %vm70_vm0, %v977_v15  ;;  %v1481_v15 = vld [vmem:[%s2233_s19] ss:$0 sm:$0xff] }
 0xb99   :  { %1712 = vmatprep.mubr.msk.f32.mxu0 %vm1815_vm1, %v1814_v2 }
 0xc54   :  { %v967_v16 = vpop.f32.mrf.mxu0 }
 0xc55   :  { %v972_v17 = vmul.f32 %v1950_v3, %v967_v16 }
 0xc56   :  { %v1702_v18 = vpop.f32.mrf.mxu0 }
 0xc57   :  { %973 = vrot.lane.b32.xlu1 %v972_v17, %s1818_s28 }
 0xc58   :  { %v1047_v19 = vpop.f32.mrf.mxu0 }
 0xc59   :  { %v1051_v20 = vmul.f32 %v1950_v3, %v1047_v19 }
 0xc5a   :  { %v1707_v21 = vpop.f32.mrf.mxu0 }
 0xc5b   :  { %1052 = vadd.xlane.f32.xlu0 %v1051_v20 }
 0xc71   :  { %1066 = vperm.xlu0 %1788, %v975_v23  }
 0xcc9   :  { %v974_v24 = vpop.permute.xlu1 %973 }
 0xcca   :  { %1709 = vmatpush3.msra.mxu0 %v974_v24 }
 0xccb   :  { %1710 = vmatprep.subr.mxu0 %v1814_v2 }
 0xccc   :  { %1711 = vmatpush3.msra.mxu0 %v972_v17 }
 0xccd   :  { %1713 = vmatmul.mubr.msk.f32.vlgmr.msra.gmra.mxu0 %vm328_vm4, %v971_v25 }
 0xcce   :  { %1717 = vmatprep.mubr.msk.f32.mxu0 %vm70_vm0, %v1150_v32 }
 0xce4   :  { %v1053_v26 = vpop.xlane.xlu0 %1052 }
 0xce5   :  { %v1054_v27 = vmul.f32 0.03125, %v1053_v26 }
 0xce7   :  { %v1055_v28 = vsub.f32 %v1051_v20, %v1054_v27 }
 0xce9   :  { %v1056_v29 = vmul.f32 %v1950_v3, %v1055_v28 }
 0xceb   :  { %v1057_v30 = vmul.f32 %v1056_v29, %v1056_v29 }
 0xcec   :  { %v1067_v37 = vpop.permute.xlu0 %1066 }
 0xced   :  { %1058 = vadd.xlane.f32.xlu1 %v1057_v30 }
 0xcfe   :  { %1072 = vperm.xlu1 %1789, %v976_v31  }
 0xd76   :  { %v1059_v33 = vpop.xlane.xlu1 %1058 }
 0xd77   :  { %v1060_v34 = vmul.f32 0.03125, %v1059_v33 }
 0xd79   :  { %v1061_v35 = vadd.f32 1e-05, %v1060_v34 }
 0xd7a   :  { %v1073_v38 = vpop.permute.xlu1 %1072 }
 0xd7b   :  { %1790 = vrsqrt.f32 %v1061_v35 }
 0xd88   :  { %v1791_v36 = vpop.eup %1790 }
 0xd89   :  { %v1063_v3 = vmul.f32 %v1791_v36, %v1055_v28 }
 0xd8b   :  { %v1069_v39 = vmul.f32 %v1067_v37, %v1063_v3 }
 0xd8d   :  { %v1075_v40 = vadd.f32 %v1073_v38, %v1069_v39  ;;  %v1146_v41 = vpop.f32.mrf.mxu0 }
 0xd8f   :  { %v1076_v42 = vmax.f32 %v1075_v40, 0.0  ;;  %v1714_v43 = vpop.f32.mrf.mxu0 }
 0xd91   :  { %v1147_v44 = vadd.f32 %v1146_v41, %v1076_v42 }
 0xd93   :  { %1715 = vmatprep.subr.mxu0 %v1147_v44 }
 0xd94   :  { %1716 = vmatpush3.msra.mxu0 %v1147_v44 }
 0xd95   :  { %1718 = vmatmul.mubr.msk.f32.vlgmr.msra.gmra.mxu0 %vm70_vm0, %v1151_v45 }
 0xd96   :  { %1720 = vmatprep.mubr.msk.f32.mxu0 %vm70_vm0, %v1152_v46 }
 0xd99   :  { %1721 = vmatmul.mubr.msk.f32.gmra.mxu0 %vm70_vm0, %v1153_v47 }
 0xd9a   :  { %1723 = vmatprep.mubr.msk.f32.mxu0 %vm70_vm0, %v1154_v48 }
 0xd9d   :  { %1724 = vmatmul.mubr.msk.f32.gmra.mxu0 %vm70_vm0, %v1155_v49 }
 0xd9e   :  { %1726 = vmatprep.mubr.msk.f32.mxu0 %vm70_vm0, %v1156_v50 }
 0xda1   :  { %1727 = vmatmul.mubr.msk.f32.gmra.mxu0 %vm70_vm0, %v1157_v51 }
 0xda2   :  { %1729 = vmatprep.mubr.msk.f32.mxu0 %vm70_vm0, %v1158_v52 }
 0xda5   :  { %1730 = vmatmul.mubr.msk.f32.gmra.mxu0 %vm70_vm0, %v1159_v53 }
 0xda6   :  { %1732 = vmatprep.mubr.msk.f32.mxu0 %vm70_vm0, %v1160_v54 }
 0xda9   :  { %1733 = vmatmul.mubr.msk.f32.gmra.mxu0 %vm70_vm0, %v1161_v55 }
 0xdaa   :  { %1735 = vmatprep.mubr.msk.f32.mxu0 %vm70_vm0, %v1162_v56 }
 0xdad   :  { %1736 = vmatmul.mubr.msk.f32.gmra.mxu0 %vm70_vm0, %v1163_v57 }
 0xdae   :  { %1738 = vmatprep.mubr.msk.f32.mxu0 %vm70_vm0, %v1164_v58 }
 0xdb1   :  { %1739 = vmatmul.mubr.msk.f32.gmra.mxu0 %vm70_vm0, %v1165_v59 }
 0xe55   :  { %v1719_v60 = vpop.f32.mrf.mxu0 }
 0xe57   :  { %v1281_v61 = vpop.f32.mrf.mxu0 }
 0xe59   :  { %v1722_v62 = vpop.f32.mrf.mxu0 }
 0xe5b   :  { %v1291_v63 = vpop.f32.mrf.mxu0 }
 0xe5d   :  { %v1725_v0 = vpop.f32.mrf.mxu0 }
 0xe5f   :  { %v1301_v1 = vpop.f32.mrf.mxu0 }
 0xe61   :  { %v1728_v4 = vpop.f32.mrf.mxu0 }
 0xe63   :  { %v1311_v5 = vpop.f32.mrf.mxu0 }
 0xe65   :  { %v1731_v6 = vpop.f32.mrf.mxu0 }
 0xe67   :  { %v1321_v7 = vpop.f32.mrf.mxu0 }
 0xe69   :  { %v1734_v8 = vpop.f32.mrf.mxu0 }
 0xe6b   :  { %v1331_v9 = vpop.f32.mrf.mxu0 }
 0xe6d   :  { %v1737_v10 = vpop.f32.mrf.mxu0 }
 0xe6f   :  { %v1341_v11 = vpop.f32.mrf.mxu0 }
 0xe71   :  { %v1740_v12 = vpop.f32.mrf.mxu0 }
 0xe72   :  { %1742 = vmatpush3.xpose.msra.mxu1 %v1740_v12 }
 0xe73   :  { %1743 = vmatprep.subr.mxu1 %v1814_v2  ;;  %v1351_v13 = vpop.f32.mrf.mxu0 }
 0xe76   :  { %1744 = vmatpush3.xpose.msra.mxu1 %v1351_v13 }
 0xe77   :  { %1745 = vmatprep.subr.mxu1 %v1814_v2 }
 0xe7a   :  { %1746 = vmatpush3.xpose.msra.mxu1 %v1737_v10 }
 0xe7b   :  { %1747 = vmatprep.subr.mxu1 %v1814_v2 }
 0xe7e   :  { %1748 = vmatpush3.xpose.msra.mxu1 %v1341_v11 }
 0xe7f   :  { %1749 = vmatprep.subr.mxu1 %v1814_v2 }
 0xe82   :  { %1750 = vmatpush3.xpose.msra.mxu1 %v1734_v8 }
 0xe83   :  { %1751 = vmatprep.subr.mxu1 %v1814_v2 }
 0xe86   :  { %1752 = vmatpush3.xpose.msra.mxu1 %v1331_v9 }
 0xe87   :  { %1753 = vmatprep.subr.mxu1 %v1814_v2 }
 0xe8a   :  { %1754 = vmatpush3.xpose.msra.mxu1 %v1731_v6 }
 0xe8b   :  { %1755 = vmatprep.subr.mxu1 %v1814_v2 }
 0xe8e   :  { %1756 = vmatpush3.xpose.msra.mxu1 %v1321_v7 }
 0xe8f   :  { %1757 = vmatprep.subr.mxu1 %v1814_v2 }
 0xe92   :  { %1758 = vmatpush3.xpose.msra.mxu1 %v1728_v4 }
 0xe93   :  { %1759 = vmatprep.subr.mxu1 %v1814_v2 }
 0xe96   :  { %1760 = vmatpush3.xpose.msra.mxu1 %v1311_v5 }
 0xe97   :  { %1761 = vmatprep.subr.mxu1 %v1814_v2 }
 0xe9a   :  { %1762 = vmatpush3.xpose.msra.mxu1 %v1725_v0 }
 0xe9b   :  { %1763 = vmatprep.subr.mxu1 %v1814_v2 }
 0xe9e   :  { %1764 = vmatpush3.xpose.msra.mxu1 %v1301_v1 }
 0xe9f   :  { %1765 = vmatprep.subr.mxu1 %v1814_v2 }
 0xea2   :  { %1766 = vmatpush3.xpose.msra.mxu1 %v1722_v62 }
 0xea3   :  { %1767 = vmatprep.subr.mxu1 %v1814_v2 }
 0xea6   :  { %1768 = vmatpush3.xpose.msra.mxu1 %v1291_v63 }
 0xea7   :  { %1769 = vmatprep.subr.mxu1 %v1814_v2 }
 0xeaa   :  { %1770 = vmatpush3.xpose.msra.mxu1 %v1719_v60 }
 0xeab   :  { %1771 = vmatprep.subr.mxu1 %v1814_v2 }
 0xeae   :  { %1772 = vmatpush3.xpose.msra.mxu1 %v1281_v61 }
 0xeb1   :  { %1774 = vmatmul.mubr.f32.vlgmr.msra.gmra.mxu1 %v68_v14 }
 0xf71   :  { %v1432_v16 = vpop.f32.mrf.mxu1 }
 0xf72   :  { %v1433_v17 = vadd.f32 %v1481_v15, %v1432_v16 }
 0xf73   :  { %v1775_v18 = vpop.f32.mrf.mxu1 }
 0xf74   :  { %1436 = vst [vmem:[#allocation2] sm:$0x3] %v1433_v17 }
 0xf75   :  { %1803 = shalt.err (!%p1800_p4)
}
 0xf76   :  { %1446 = dma.vmem_to_hbm [thread:$0]  %s1444_s8, 32, %s2234_s20, [#allocation3]  }
 0xf77   :  { %1812 = dma.done.wait [#allocation3], 32  }
 0xf78   :  { %1813 = vsyncadd [#allocation3], 4294967264 }
 0xf79   :  { %1450 = vsyncpa [#allocation3], 1 }

</bundles_post_ra>
